<compile_context>
chip_gen: v5e
topology: v5e:2x2
jax: 0.10.0
libtpu: 0.0.40
codegen_flags: <defaults>
</compile_context>

<pallas_src>
import functools

import jax
import jax.numpy as jnp
from jax.experimental import pallas as pl
from jax.experimental.pallas import tpu as pltpu

_MiB = 1024 * 1024


def _bilinear_matrix(out_size: int, in_size: int, dtype=jnp.float32) -> jnp.ndarray:
    """1-D bilinear interpolation matrix, torch align_corners=False convention."""
    scale = in_size / out_size
    dst = jnp.arange(out_size, dtype=jnp.float32)
    # torch's area_pixel_compute_source_index (non-cubic): clamp to >= 0
    src = jnp.maximum((dst + 0.5) * scale - 0.5, 0.0)
    x0f = jnp.floor(src)
    lam = src - x0f                     # weight of the upper neighbor
    x0 = x0f.astype(jnp.int32)
    x1 = jnp.minimum(x0 + 1, in_size - 1)
    cols = jnp.arange(in_size, dtype=jnp.int32)
    w0 = (cols[None, :] == x0[:, None]).astype(jnp.float32) * (1.0 - lam)[:, None]
    w1 = (cols[None, :] == x1[:, None]).astype(jnp.float32) * lam[:, None]
    return (w0 + w1).astype(dtype)      # (out_size, in_size)


def _tpu_memory_model():
    """Returns (per-core VMEM bytes, is_multi_tensorcore_chip) with safe fallbacks."""
    vmem = 128 * _MiB
    try:
        info = pltpu.get_tpu_info()
        vmem = int(getattr(info, "vmem_capacity_bytes", vmem)) or vmem
    except Exception:
        pass
    multi_tc = vmem <= 64 * _MiB        # v7x-class: 64 MiB per core, 2 TCs per chip
    try:
        kind = jax.devices()[0].device_kind.lower()
        if "v7" in kind or "7x" in kind:
            multi_tc = True
    except Exception:
        pass
    return vmem, multi_tc


def _pick_plane_block(n_planes, per_plane_bytes, fixed_bytes, budget_bytes, multi_tc):
    """Largest P (<=16) dividing n_planes whose VMEM footprint fits the budget.

    On 2-TC chips (v7x) prefer a P that leaves >= 2 grid steps so both cores get
    work; on single-TC chips take the biggest fitting block. Always returns >= 1
    (graceful degradation instead of refusing to compile).
    """
    best_any = 1
    best_multi = 0
    for cand in range(1, min(n_planes, 16) + 1):
        if n_planes % cand != 0:
            continue
        if fixed_bytes + cand * per_plane_bytes > budget_bytes:
            continue
        best_any = cand
        if n_planes // cand >= 2:
            best_multi = cand
    if multi_tc and best_multi >= 1:
        return best_multi
    return best_any


@functools.partial(jax.jit,
                   static_argnames=("size", "interpolation_mode", "compute_dtype"))
def resize_pre_processor(imgs: jnp.ndarray,
                         size: tuple[int, int],
                         interpolation_mode: str = "bilinear",
                         compute_dtype=jnp.float32):
    """JAX/Pallas equivalent of kornia ResizePreProcessor.forward for an NCHW batch."""
    if interpolation_mode != "bilinear":
        raise NotImplementedError("only 'bilinear' is implemented")

    B, C, H, W = imgs.shape
    out_h, out_w = size

    # Interpolation matrices (trace-time constants). A_w is pre-transposed.
    ah = _bilinear_matrix(out_h, H, dtype=compute_dtype)        # (out_h, H)
    awT = _bilinear_matrix(out_w, W, dtype=compute_dtype).T     # (W, out_w)

    # Static matmul-order choice (MAC count per plane).
    cost_w_first = H * out_w * (W + out_h)     # img @ A_w^T, then A_h @ tmp
    cost_h_first = out_h * W * (H + out_w)     # A_h @ img,   then tmp @ A_w^T
    w_first = cost_w_first <= cost_h_first

    io_bytes = jnp.dtype(imgs.dtype).itemsize
    cdt_bytes = jnp.dtype(compute_dtype).itemsize
    needs_cast = jnp.dtype(compute_dtype) != jnp.dtype(imgs.dtype)

    # ---- VMEM-aware plane-block (P) selection + generation-specific vmem limit ----
    vmem_cap, multi_tc = _tpu_memory_model()
    if vmem_cap <= 64 * _MiB:          # v7x-class core: leave Mosaic scratch headroom
        limit_cap = min(int(vmem_cap * 0.85), 56 * _MiB)
    else:                              # v5e / v6e: 128 MiB physical VMEM
        limit_cap = min(int(vmem_cap * 0.82), 104 * _MiB)

    stage1_elems = H * out_w if w_first else out_h * W
    # In-kernel temporaries: only ONE plane's intermediate is live at a time.
    temp_bytes = (stage1_elems * (4 + (cdt_bytes if needs_cast else 0))
                  + (H * W * cdt_bytes if needs_cast else 0)
                  + out_h * out_w * 4)
    # Resident interpolation matrices (fetched once, not double-buffered).
    fixed_bytes = (out_h * H + W * out_w) * cdt_bytes + temp_bytes
    # Double-buffered input & output blocks, per plane.
    per_plane_bytes = 2 * H * W * io_bytes + 2 * out_h * out_w * io_bytes

    budget = int(limit_cap * 0.75)
    N = B * C
    P = _pick_plane_block(N, per_plane_bytes, fixed_bytes, budget, multi_tc)

    need = fixed_bytes + P * per_plane_bytes
    vmem_limit = int(min(limit_cap, max(int(need * 1.25), 32 * _MiB)))

    planes = imgs.reshape(N, H, W)

    def kernel(img_ref, ah_ref, awT_ref, out_ref):
        a_h = ah_ref[...]                                      # (out_h, H)
        a_wT = awT_ref[...]                                    # (W, out_w)
        # Fused per-plane two-stage resize: bounded live intermediate, no concat,
        # no (P*H, W) reshape (so no cross-tile relayout copies).
        for p in range(P):                                     # static unroll
            img_p = img_ref[p].astype(compute_dtype)           # (H, W)
            if w_first:
                tmp = jnp.dot(img_p, a_wT,
                              preferred_element_type=jnp.float32)      # (H, out_w)
                out_p = jnp.dot(a_h, tmp.astype(compute_dtype),
                                preferred_element_type=jnp.float32)    # (out_h, out_w)
            else:
                tmp = jnp.dot(a_h, img_p,
                              preferred_element_type=jnp.float32)      # (out_h, W)
                out_p = jnp.dot(tmp.astype(compute_dtype), a_wT,
                                preferred_element_type=jnp.float32)    # (out_h, out_w)
            out_ref[p] = out_p.astype(out_ref.dtype)

    resized_planes = pl.pallas_call(
        kernel,
        out_shape=jax.ShapeDtypeStruct((N, out_h, out_w), imgs.dtype),
        grid_spec=pltpu.PrefetchScalarGridSpec(
            num_scalar_prefetch=0,
            grid=(N // P,),
            in_specs=[
                pl.BlockSpec((P, H, W), lambda i: (i, 0, 0)),      # P image planes
                pl.BlockSpec((out_h, H), lambda i: (0, 0)),        # A_h   (resident)
                pl.BlockSpec((W, out_w), lambda i: (0, 0)),        # A_w^T (resident)
            ],
            out_specs=pl.BlockSpec((P, out_h, out_w), lambda i: (i, 0, 0)),
        ),
        compiler_params=pltpu.CompilerParams(
            dimension_semantics=("parallel",),
            vmem_limit_bytes=vmem_limit),
    )(planes, ah, awT)

    resized_imgs = resized_planes.reshape(B, C, out_h, out_w)

    # original_sizes in imgs.dtype, matching torch's `img.new_zeros` semantics.
    # (Note: lossy for bf16/fp16 images, exactly as the torch module is.)
    original_sizes = jnp.broadcast_to(
        jnp.asarray([H, W], dtype=jnp.float32), (B, 2)).astype(imgs.dtype)

    return resized_imgs, original_sizes


if __name__ == "__main__":
    key = jax.random.PRNGKey(0)
    B, C, H, W = 2, 4, 16, 16
    x = jax.random.normal(key, (B, C, H, W), dtype=jnp.float32)

    # --- case 1: (8, 12) output — exercises the H-resize-first branch (exact f32) ---
    size1 = (8, 12)
    r1, sizes1 = resize_pre_processor(x, size1)
    r1 = jax.block_until_ready(r1)
    sizes1 = jax.block_until_ready(sizes1)

    ah1 = _bilinear_matrix(size1[0], H)
    aw1 = _bilinear_matrix(size1[1], W)
    ref1 = jnp.einsum("oh,bchw,pw->bcop", ah1, x, aw1)

    assert r1.shape == (B, C, size1[0], size1[1])
    assert sizes1.shape == (B, 2)
    assert jnp.allclose(r1, ref1, atol=1e-5, rtol=1e-5), \
        float(jnp.max(jnp.abs(r1 - ref1)))
    assert jnp.allclose(sizes1, jnp.array([[H, W]] * B, dtype=jnp.float32))

    # --- case 2: (12, 8) output — exercises the W-resize-first branch (exact f32) ---
    size2 = (12, 8)
    r2, _ = resize_pre_processor(x, size2)
    r2 = jax.block_until_ready(r2)
    ah2 = _bilinear_matrix(size2[0], H)
    aw2 = _bilinear_matrix(size2[1], W)
    ref2 = jnp.einsum("oh,bchw,pw->bcop", ah2, x, aw2)
    assert jnp.allclose(r2, ref2, atol=1e-5, rtol=1e-5), \
        float(jnp.max(jnp.abs(r2 - ref2)))

    # --- case 3: bf16 compute path (MXU-native); ~1e-2 relative error expected ---
    r3, _ = resize_pre_processor(x, size1, compute_dtype=jnp.bfloat16)
    r3 = jax.block_until_ready(r3)
    assert jnp.allclose(r3, ref1, atol=1e-1, rtol=5e-2), \
        float(jnp.max(jnp.abs(r3 - ref1)))

    print("KERNEL_OK")
</pallas_src>

<mosaic_0001>
module attributes {stable_mosaic.version = 11 : i64} {
  func.func @kernel(%arg0: i32, %arg1: memref<8x16x16xf32, #tpu.memory_space<vmem>>, %arg2: memref<8x16xf32, #tpu.memory_space<vmem>>, %arg3: memref<16x12xf32, #tpu.memory_space<vmem>>, %arg4: memref<8x8x12xf32, #tpu.memory_space<vmem>>) attributes {dimension_semantics = [#tpu.dimension_semantics<parallel>], iteration_bounds = array<i64: 1>, scalar_prefetch = 0 : i64, scratch_operands = 0 : i64, tpu.core_type = #tpu.core_type<tc>, window_params = [{transform_indices = @transform_0, window_bounds = array<i64: 8, 16, 16>}, {pipeline_mode = #tpu.pipeline_mode<synchronous>, transform_indices = @transform_1, window_bounds = array<i64: 8, 16>}, {pipeline_mode = #tpu.pipeline_mode<synchronous>, transform_indices = @transform_2, window_bounds = array<i64: 16, 12>}, {transform_indices = @transform_3, window_bounds = array<i64: 8, 8, 12>}]} {
    %c0 = arith.constant 0 : index
    %c0_0 = arith.constant 0 : index
    %0 = vector.load %arg2[%c0, %c0_0] : memref<8x16xf32, #tpu.memory_space<vmem>>, vector<8x16xf32>
    %c0_1 = arith.constant 0 : index
    %c0_2 = arith.constant 0 : index
    %1 = vector.load %arg3[%c0_1, %c0_2] : memref<16x12xf32, #tpu.memory_space<vmem>>, vector<16x12xf32>
    %c0_3 = arith.constant 0 : index
    %c0_4 = arith.constant 0 : index
    %c0_5 = arith.constant 0 : index
    %2 = vector.load %arg1[%c0_3, %c0_4, %c0_5] : memref<8x16x16xf32, #tpu.memory_space<vmem>>, vector<1x16x16xf32>
    %3 = vector.shape_cast %2 : vector<1x16x16xf32> to vector<16x16xf32>
    %cst = arith.constant dense<0.000000e+00> : vector<8x16xf32>
    %4 = tpu.matmul %0, %3, %cst {dimension_numbers = #tpu.dot_dimension_numbers<[1], [0], [0], [1], [0, 0, 1, 1], [], []>} : vector<8x16xf32>, vector<16x16xf32>, vector<8x16xf32> -> vector<8x16xf32>
    %cst_6 = arith.constant dense<0.000000e+00> : vector<8x12xf32>
    %5 = tpu.matmul %4, %1, %cst_6 {dimension_numbers = #tpu.dot_dimension_numbers<[1], [0], [0], [1], [0, 0, 1, 1], [], []>} : vector<8x16xf32>, vector<16x12xf32>, vector<8x12xf32> -> vector<8x12xf32>
    %c0_7 = arith.constant 0 : index
    %c0_8 = arith.constant 0 : index
    %c0_9 = arith.constant 0 : index
    %6 = vector.load %arg4[%c0_7, %c0_8, %c0_9] : memref<8x8x12xf32, #tpu.memory_space<vmem>>, vector<1x8x12xf32>
    %7 = vector.shape_cast %6 : vector<1x8x12xf32> to vector<8x12xf32>
    %8 = vector.shape_cast %5 : vector<8x12xf32> to vector<1x8x12xf32>
    tpu.vector_store %arg4[%c0_7, %c0_8, %c0_9], %8 {strides = array<i32>} : memref<8x8x12xf32, #tpu.memory_space<vmem>>, vector<1x8x12xf32>,
    %c1 = arith.constant 1 : index
    %c0_10 = arith.constant 0 : index
    %c0_11 = arith.constant 0 : index
    %9 = vector.load %arg1[%c1, %c0_10, %c0_11] : memref<8x16x16xf32, #tpu.memory_space<vmem>>, vector<1x16x16xf32>
    %10 = vector.shape_cast %9 : vector<1x16x16xf32> to vector<16x16xf32>
    %cst_12 = arith.constant dense<0.000000e+00> : vector<8x16xf32>
    %11 = tpu.matmul %0, %10, %cst_12 {dimension_numbers = #tpu.dot_dimension_numbers<[1], [0], [0], [1], [0, 0, 1, 1], [], []>} : vector<8x16xf32>, vector<16x16xf32>, vector<8x16xf32> -> vector<8x16xf32>
    %cst_13 = arith.constant dense<0.000000e+00> : vector<8x12xf32>
    %12 = tpu.matmul %11, %1, %cst_13 {dimension_numbers = #tpu.dot_dimension_numbers<[1], [0], [0], [1], [0, 0, 1, 1], [], []>} : vector<8x16xf32>, vector<16x12xf32>, vector<8x12xf32> -> vector<8x12xf32>
    %c1_14 = arith.constant 1 : index
    %c0_15 = arith.constant 0 : index
    %c0_16 = arith.constant 0 : index
    %13 = vector.load %arg4[%c1_14, %c0_15, %c0_16] : memref<8x8x12xf32, #tpu.memory_space<vmem>>, vector<1x8x12xf32>
    %14 = vector.shape_cast %13 : vector<1x8x12xf32> to vector<8x12xf32>
    %15 = vector.shape_cast %12 : vector<8x12xf32> to vector<1x8x12xf32>
    tpu.vector_store %arg4[%c1_14, %c0_15, %c0_16], %15 {strides = array<i32>} : memref<8x8x12xf32, #tpu.memory_space<vmem>>, vector<1x8x12xf32>,
    %c2 = arith.constant 2 : index
    %c0_17 = arith.constant 0 : index
    %c0_18 = arith.constant 0 : index
    %16 = vector.load %arg1[%c2, %c0_17, %c0_18] : memref<8x16x16xf32, #tpu.memory_space<vmem>>, vector<1x16x16xf32>
    %17 = vector.shape_cast %16 : vector<1x16x16xf32> to vector<16x16xf32>
    %cst_19 = arith.constant dense<0.000000e+00> : vector<8x16xf32>
    %18 = tpu.matmul %0, %17, %cst_19 {dimension_numbers = #tpu.dot_dimension_numbers<[1], [0], [0], [1], [0, 0, 1, 1], [], []>} : vector<8x16xf32>, vector<16x16xf32>, vector<8x16xf32> -> vector<8x16xf32>
    %cst_20 = arith.constant dense<0.000000e+00> : vector<8x12xf32>
    %19 = tpu.matmul %18, %1, %cst_20 {dimension_numbers = #tpu.dot_dimension_numbers<[1], [0], [0], [1], [0, 0, 1, 1], [], []>} : vector<8x16xf32>, vector<16x12xf32>, vector<8x12xf32> -> vector<8x12xf32>
    %c2_21 = arith.constant 2 : index
    %c0_22 = arith.constant 0 : index
    %c0_23 = arith.constant 0 : index
    %20 = vector.load %arg4[%c2_21, %c0_22, %c0_23] : memref<8x8x12xf32, #tpu.memory_space<vmem>>, vector<1x8x12xf32>
    %21 = vector.shape_cast %20 : vector<1x8x12xf32> to vector<8x12xf32>
    %22 = vector.shape_cast %19 : vector<8x12xf32> to vector<1x8x12xf32>
    tpu.vector_store %arg4[%c2_21, %c0_22, %c0_23], %22 {strides = array<i32>} : memref<8x8x12xf32, #tpu.memory_space<vmem>>, vector<1x8x12xf32>,
    %c3 = arith.constant 3 : index
    %c0_24 = arith.constant 0 : index
    %c0_25 = arith.constant 0 : index
    %23 = vector.load %arg1[%c3, %c0_24, %c0_25] : memref<8x16x16xf32, #tpu.memory_space<vmem>>, vector<1x16x16xf32>
    %24 = vector.shape_cast %23 : vector<1x16x16xf32> to vector<16x16xf32>
    %cst_26 = arith.constant dense<0.000000e+00> : vector<8x16xf32>
    %25 = tpu.matmul %0, %24, %cst_26 {dimension_numbers = #tpu.dot_dimension_numbers<[1], [0], [0], [1], [0, 0, 1, 1], [], []>} : vector<8x16xf32>, vector<16x16xf32>, vector<8x16xf32> -> vector<8x16xf32>
    %cst_27 = arith.constant dense<0.000000e+00> : vector<8x12xf32>
    %26 = tpu.matmul %25, %1, %cst_27 {dimension_numbers = #tpu.dot_dimension_numbers<[1], [0], [0], [1], [0, 0, 1, 1], [], []>} : vector<8x16xf32>, vector<16x12xf32>, vector<8x12xf32> -> vector<8x12xf32>
    %c3_28 = arith.constant 3 : index
    %c0_29 = arith.constant 0 : index
    %c0_30 = arith.constant 0 : index
    %27 = vector.load %arg4[%c3_28, %c0_29, %c0_30] : memref<8x8x12xf32, #tpu.memory_space<vmem>>, vector<1x8x12xf32>
    %28 = vector.shape_cast %27 : vector<1x8x12xf32> to vector<8x12xf32>
    %29 = vector.shape_cast %26 : vector<8x12xf32> to vector<1x8x12xf32>
    tpu.vector_store %arg4[%c3_28, %c0_29, %c0_30], %29 {strides = array<i32>} : memref<8x8x12xf32, #tpu.memory_space<vmem>>, vector<1x8x12xf32>,
    %c4 = arith.constant 4 : index
    %c0_31 = arith.constant 0 : index
    %c0_32 = arith.constant 0 : index
    %30 = vector.load %arg1[%c4, %c0_31, %c0_32] : memref<8x16x16xf32, #tpu.memory_space<vmem>>, vector<1x16x16xf32>
    %31 = vector.shape_cast %30 : vector<1x16x16xf32> to vector<16x16xf32>
    %cst_33 = arith.constant dense<0.000000e+00> : vector<8x16xf32>
    %32 = tpu.matmul %0, %31, %cst_33 {dimension_numbers = #tpu.dot_dimension_numbers<[1], [0], [0], [1], [0, 0, 1, 1], [], []>} : vector<8x16xf32>, vector<16x16xf32>, vector<8x16xf32> -> vector<8x16xf32>
    %cst_34 = arith.constant dense<0.000000e+00> : vector<8x12xf32>
    %33 = tpu.matmul %32, %1, %cst_34 {dimension_numbers = #tpu.dot_dimension_numbers<[1], [0], [0], [1], [0, 0, 1, 1], [], []>} : vector<8x16xf32>, vector<16x12xf32>, vector<8x12xf32> -> vector<8x12xf32>
    %c4_35 = arith.constant 4 : index
    %c0_36 = arith.constant 0 : index
    %c0_37 = arith.constant 0 : index
    %34 = vector.load %arg4[%c4_35, %c0_36, %c0_37] : memref<8x8x12xf32, #tpu.memory_space<vmem>>, vector<1x8x12xf32>
    %35 = vector.shape_cast %34 : vector<1x8x12xf32> to vector<8x12xf32>
    %36 = vector.shape_cast %33 : vector<8x12xf32> to vector<1x8x12xf32>
    tpu.vector_store %arg4[%c4_35, %c0_36, %c0_37], %36 {strides = array<i32>} : memref<8x8x12xf32, #tpu.memory_space<vmem>>, vector<1x8x12xf32>,
    %c5 = arith.constant 5 : index
    %c0_38 = arith.constant 0 : index
    %c0_39 = arith.constant 0 : index
    %37 = vector.load %arg1[%c5, %c0_38, %c0_39] : memref<8x16x16xf32, #tpu.memory_space<vmem>>, vector<1x16x16xf32>
    %38 = vector.shape_cast %37 : vector<1x16x16xf32> to vector<16x16xf32>
    %cst_40 = arith.constant dense<0.000000e+00> : vector<8x16xf32>
    %39 = tpu.matmul %0, %38, %cst_40 {dimension_numbers = #tpu.dot_dimension_numbers<[1], [0], [0], [1], [0, 0, 1, 1], [], []>} : vector<8x16xf32>, vector<16x16xf32>, vector<8x16xf32> -> vector<8x16xf32>
    %cst_41 = arith.constant dense<0.000000e+00> : vector<8x12xf32>
    %40 = tpu.matmul %39, %1, %cst_41 {dimension_numbers = #tpu.dot_dimension_numbers<[1], [0], [0], [1], [0, 0, 1, 1], [], []>} : vector<8x16xf32>, vector<16x12xf32>, vector<8x12xf32> -> vector<8x12xf32>
    %c5_42 = arith.constant 5 : index
    %c0_43 = arith.constant 0 : index
    %c0_44 = arith.constant 0 : index
    %41 = vector.load %arg4[%c5_42, %c0_43, %c0_44] : memref<8x8x12xf32, #tpu.memory_space<vmem>>, vector<1x8x12xf32>
    %42 = vector.shape_cast %41 : vector<1x8x12xf32> to vector<8x12xf32>
    %43 = vector.shape_cast %40 : vector<8x12xf32> to vector<1x8x12xf32>
    tpu.vector_store %arg4[%c5_42, %c0_43, %c0_44], %43 {strides = array<i32>} : memref<8x8x12xf32, #tpu.memory_space<vmem>>, vector<1x8x12xf32>,
    %c6 = arith.constant 6 : index
    %c0_45 = arith.constant 0 : index
    %c0_46 = arith.constant 0 : index
    %44 = vector.load %arg1[%c6, %c0_45, %c0_46] : memref<8x16x16xf32, #tpu.memory_space<vmem>>, vector<1x16x16xf32>
    %45 = vector.shape_cast %44 : vector<1x16x16xf32> to vector<16x16xf32>
    %cst_47 = arith.constant dense<0.000000e+00> : vector<8x16xf32>
    %46 = tpu.matmul %0, %45, %cst_47 {dimension_numbers = #tpu.dot_dimension_numbers<[1], [0], [0], [1], [0, 0, 1, 1], [], []>} : vector<8x16xf32>, vector<16x16xf32>, vector<8x16xf32> -> vector<8x16xf32>
    %cst_48 = arith.constant dense<0.000000e+00> : vector<8x12xf32>
    %47 = tpu.matmul %46, %1, %cst_48 {dimension_numbers = #tpu.dot_dimension_numbers<[1], [0], [0], [1], [0, 0, 1, 1], [], []>} : vector<8x16xf32>, vector<16x12xf32>, vector<8x12xf32> -> vector<8x12xf32>
    %c6_49 = arith.constant 6 : index
    %c0_50 = arith.constant 0 : index
    %c0_51 = arith.constant 0 : index
    %48 = vector.load %arg4[%c6_49, %c0_50, %c0_51] : memref<8x8x12xf32, #tpu.memory_space<vmem>>, vector<1x8x12xf32>
    %49 = vector.shape_cast %48 : vector<1x8x12xf32> to vector<8x12xf32>
    %50 = vector.shape_cast %47 : vector<8x12xf32> to vector<1x8x12xf32>
    tpu.vector_store %arg4[%c6_49, %c0_50, %c0_51], %50 {strides = array<i32>} : memref<8x8x12xf32, #tpu.memory_space<vmem>>, vector<1x8x12xf32>,
    %c7 = arith.constant 7 : index
    %c0_52 = arith.constant 0 : index
    %c0_53 = arith.constant 0 : index
    %51 = vector.load %arg1[%c7, %c0_52, %c0_53] : memref<8x16x16xf32, #tpu.memory_space<vmem>>, vector<1x16x16xf32>
    %52 = vector.shape_cast %51 : vector<1x16x16xf32> to vector<16x16xf32>
    %cst_54 = arith.constant dense<0.000000e+00> : vector<8x16xf32>
    %53 = tpu.matmul %0, %52, %cst_54 {dimension_numbers = #tpu.dot_dimension_numbers<[1], [0], [0], [1], [0, 0, 1, 1], [], []>} : vector<8x16xf32>, vector<16x16xf32>, vector<8x16xf32> -> vector<8x16xf32>
    %cst_55 = arith.constant dense<0.000000e+00> : vector<8x12xf32>
    %54 = tpu.matmul %53, %1, %cst_55 {dimension_numbers = #tpu.dot_dimension_numbers<[1], [0], [0], [1], [0, 0, 1, 1], [], []>} : vector<8x16xf32>, vector<16x12xf32>, vector<8x12xf32> -> vector<8x12xf32>
    %c7_56 = arith.constant 7 : index
    %c0_57 = arith.constant 0 : index
    %c0_58 = arith.constant 0 : index
    %55 = vector.load %arg4[%c7_56, %c0_57, %c0_58] : memref<8x8x12xf32, #tpu.memory_space<vmem>>, vector<1x8x12xf32>
    %56 = vector.shape_cast %55 : vector<1x8x12xf32> to vector<8x12xf32>
    %57 = vector.shape_cast %54 : vector<8x12xf32> to vector<1x8x12xf32>
    tpu.vector_store %arg4[%c7_56, %c0_57, %c0_58], %57 {strides = array<i32>} : memref<8x8x12xf32, #tpu.memory_space<vmem>>, vector<1x8x12xf32>,
    return
  }
  func.func @transform_0(%arg0: i32) -> (i32, i32, i32) {
    %c0_i32 = arith.constant 0 : i32
    %c0_i32_0 = arith.constant 0 : i32
    %c0_i32_1 = arith.constant 0 : i32
    return %arg0, %c0_i32, %c0_i32_0 : i32, i32, i32
  }
  func.func @transform_1(%arg0: i32) -> (i32, i32) {
    %c0_i32 = arith.constant 0 : i32
    %c0_i32_0 = arith.constant 0 : i32
    %c0_i32_1 = arith.constant 0 : i32
    return %c0_i32, %c0_i32_0 : i32, i32
  }
  func.func @transform_2(%arg0: i32) -> (i32, i32) {
    %c0_i32 = arith.constant 0 : i32
    %c0_i32_0 = arith.constant 0 : i32
    %c0_i32_1 = arith.constant 0 : i32
    return %c0_i32, %c0_i32_0 : i32, i32
  }
  func.func @transform_3(%arg0: i32) -> (i32, i32, i32) {
    %c0_i32 = arith.constant 0 : i32
    %c0_i32_0 = arith.constant 0 : i32
    %c0_i32_1 = arith.constant 0 : i32
    return %arg0, %c0_i32, %c0_i32_0 : i32, i32, i32
  }
}

</mosaic_0001>

<bundles_post_ra>
// kernel: resize_pre_processor.1
= control target key start
LH: loop header
LB: loop body
LE: loop exit
PB: predicated region body
PF: predicated region fallthrough
CT: control target
= control target key end

     0   :  { %8 = vsyncpa [#allocation3], 0  ;;  %s581_s0 = inlined_call_operand.hbm [shape: f32[8,16,16], index: 0, kind: input, shape index: {}]   ;;  %s582_s1 = inlined_call_operand.vmem [shape: f32[8,16], index: 1, kind: input, shape index: {}]   ;;  %s583_s2 = inlined_call_operand.vmem [shape: f32[16,12], index: 2, kind: input, shape index: {}]   ;;  %s584_s3 = inlined_call_operand.hbm [shape: f32[8,8,12], index: 3, kind: output, shape index: {}]  }
   0x1   :  { %9 = vsyncpa [#allocation4], 0  ;;  %s14_s14 = sshll.u32 %s581_s0, 4  ;;  %s512_s15 = smov [#allocation2]   ;;  %s15_s14 = int_to_ptr.hbm [resolvable:$true] %s14_s14 }
   0x2   :  { %s16_s16 = sshll.u32 %s512_s15, 4  ;;  %s513_s17 = smov 128   ;;  %s17_s16 = int_to_ptr.vmem [resolvable:$true] %s16_s16 }
   0x3   :  { %s514_s18 = smov 8  }
   0x4   :  { %22 = dma.hbm_to_vmem [thread:$0]  %s15_s14, 2048, %s17_s16, [#allocation3], %s513_s17, %s513_s17, %s514_s18  }
   0x5   :  { %508 = dma.done.wait [#allocation3], 2048  }
   0x6   :  { %509 = vsyncadd [#allocation3], 4294965248  ;;  %v87_v0 = vld [vmem:[#allocation2 + $0x18] sm:$0xff]  ;;  %v86_v1 = vld [vmem:[#allocation2 + $0x10] sm:$0xff]  ;;  %vm36_vm0 = vcmask 130048   ;;  %vm83_vm1 = vcmask 97280  }
   0x7   :  { %102 = vmatpush.msra.mxu2 %v87_v0  ;;  %v31_v2 = vld [vmem:[%s582_s1] sm:$0xff]  ;;  %v183_v3 = vld [vmem:[#allocation2 + $0x38] sm:$0xff]  ;;  %v35_v4 = vld [vmem:[#allocation2 + $0x8] sm:$0xff]  ;;  %s427_s26 = sshll.u32 %s584_s3, 4  ;;  %s428_s26 = int_to_ptr.hbm [resolvable:$true] %s427_s26 }
   0x8   :  { %v34_v5 = vld [vmem:[#allocation2] sm:$0xff]  ;;  %54 = vmatpush.msra.mxu0 %v35_v4  ;;  %v182_v6 = vld [vmem:[#allocation2 + $0x30] sm:$0xff]  ;;  %v135_v7 = vld [vmem:[#allocation2 + $0x28] sm:$0xff] }
   0x9   :  { %103 = vmatpush.msra.mxu2 %v86_v1  ;;  %v279_v8 = vld [vmem:[#allocation2 + $0x58] sm:$0xff]  ;;  %v33_v9 = vld [vmem:[%s583_s2 + $0x8] sm:$0xff]  ;;  %v134_v10 = vld [vmem:[#allocation2 + $0x20] sm:$0xff] }
   0xa   :  { %442 = vmatmul.msk.f32.vlgmr.msra.gmra.mxu2 %vm36_vm0, %v31_v2  ;;  %55 = vmatpush.msra.mxu0 %v34_v5  ;;  %v278_v11 = vld [vmem:[#allocation2 + $0x50] sm:$0xff]  ;;  %v231_v12 = vld [vmem:[#allocation2 + $0x48] sm:$0xff]  ;;  %v230_v13 = vld [vmem:[#allocation2 + $0x40] sm:$0xff] }
   0xb   :  { %198 = vmatpush.msrb.mxu2 %v183_v3  ;;  %440 = vmatmul.msk.f32.vlgmr.msra.gmra.mxu0 %vm36_vm0, %v31_v2  ;;  %v375_v14 = vld [vmem:[#allocation2 + $0x78] sm:$0xff]  ;;  %v374_v15 = vld [vmem:[#allocation2 + $0x70] sm:$0xff]  ;;  %v327_v16 = vld [vmem:[#allocation2 + $0x68] sm:$0xff] }
   0xc   :  { %125 = vmatpush.msra.mxu3 %v33_v9  ;;  %150 = vmatpush.msrb.mxu0 %v135_v7  ;;  %v326_v17 = vld [vmem:[#allocation2 + $0x60] sm:$0xff] }
   0xd   :  { %199 = vmatpush.msrb.mxu2 %v182_v6  ;;  %77 = vmatpush.msra.mxu1 %v33_v9  ;;  %v32_v18 = vld [vmem:[%s583_s2] sm:$0xff]  ;;  %s515_s2 = smov [#allocation5]  }
   0xe   :  { %151 = vmatpush.msrb.mxu0 %v134_v10  ;;  %126 = vmatpush.msra.mxu3 %v32_v18  ;;  %s425_s23 = sshll.u32 %s515_s2, 4  ;;  %s426_s23 = int_to_ptr.vmem [resolvable:$true] %s425_s23 }
   0xf   :  { %294 = vmatpush.msra.mxu2 %v279_v8  ;;  %78 = vmatpush.msra.mxu1 %v32_v18 }
  0x10   :  { %246 = vmatpush.msra.mxu0 %v231_v12  ;;  %221 = vmatpush.msrb.mxu3 %v33_v9 }
  0x11   :  { %295 = vmatpush.msra.mxu2 %v278_v11  ;;  %173 = vmatpush.msrb.mxu1 %v33_v9 }
  0x12   :  { %446 = vmatmul.msk.f32.vlgmr.msrb.gmra.mxu2 %vm36_vm0, %v31_v2  ;;  %247 = vmatpush.msra.mxu0 %v230_v13 }
  0x13   :  { %390 = vmatpush.msrb.mxu2 %v375_v14  ;;  %444 = vmatmul.msk.f32.vlgmr.msrb.gmra.mxu0 %vm36_vm0, %v31_v2 }
  0x14   :  { %342 = vmatpush.msrb.mxu0 %v327_v16  ;;  %222 = vmatpush.msrb.mxu3 %v32_v18 }
  0x15   :  { %391 = vmatpush.msrb.mxu2 %v374_v15  ;;  %174 = vmatpush.msrb.mxu1 %v32_v18 }
  0x16   :  { %343 = vmatpush.msrb.mxu0 %v326_v17 }
  0x1a   :  { %450 = vmatmul.msk.f32.vlgmr.msra.gmra.mxu2 %vm36_vm0, %v31_v2 }
  0x1b   :  { %448 = vmatmul.msk.f32.vlgmr.msra.gmra.mxu0 %vm36_vm0, %v31_v2 }
  0x22   :  { %454 = vmatmul.msk.f32.vlgmr.msrb.gmra.mxu2 %vm36_vm0, %v31_v2 }
  0x23   :  { %452 = vmatmul.msk.f32.vlgmr.msrb.gmra.mxu0 %vm36_vm0, %v31_v2 }
  0x88   :  { %v57_v19 = vpop.f32.mrf.mxu0 }
  0x89   :  { %441 = vmatmul.msk.f32.vlgmr.msra.gmra.mxu1 %vm36_vm0, %v57_v19 }
  0x8a   :  { %269 = vmatpush.msra.mxu1 %v33_v9 }
  0x8c   :  { %270 = vmatpush.msra.mxu1 %v32_v18 }
  0x8d   :  { %v105_v20 = vpop.f32.mrf.mxu2 }
  0x8e   :  { %443 = vmatmul.msk.f32.vlgmr.msra.gmra.mxu3 %vm36_vm0, %v105_v20 }
  0x8f   :  { %317 = vmatpush.msra.mxu3 %v33_v9 }
  0x90   :  { %v153_v21 = vpop.f32.mrf.mxu0 }
  0x91   :  { %318 = vmatpush.msra.mxu3 %v32_v18  ;;  %445 = vmatmul.msk.f32.vlgmr.msrb.gmra.mxu1 %vm36_vm0, %v153_v21 }
  0x92   :  { %365 = vmatpush.msrb.mxu1 %v33_v9 }
  0x94   :  { %366 = vmatpush.msrb.mxu1 %v32_v18 }
  0x95   :  { %v201_v22 = vpop.f32.mrf.mxu2 }
  0x96   :  { %447 = vmatmul.msk.f32.vlgmr.msrb.gmra.mxu3 %vm36_vm0, %v201_v22 }
  0x97   :  { %413 = vmatpush.msrb.mxu3 %v33_v9 }
  0x98   :  { %v249_v23 = vpop.f32.mrf.mxu0 }
  0x99   :  { %414 = vmatpush.msrb.mxu3 %v32_v18  ;;  %449 = vmatmul.msk.f32.vlgmr.msra.gmra.mxu1 %vm36_vm0, %v249_v23 }
  0x9d   :  { %v297_v24 = vpop.f32.mrf.mxu2 }
  0x9e   :  { %451 = vmatmul.msk.f32.vlgmr.msra.gmra.mxu3 %vm36_vm0, %v297_v24 }
  0xa0   :  { %v345_v25 = vpop.f32.mrf.mxu0 }
  0xa1   :  { %453 = vmatmul.msk.f32.vlgmr.msrb.gmra.mxu1 %vm36_vm0, %v345_v25 }
  0xa5   :  { %v393_v26 = vpop.f32.mrf.mxu2 }
  0xa6   :  { %455 = vmatmul.msk.f32.vlgmr.msrb.gmra.mxu3 %vm36_vm0, %v393_v26 }
 0x106   :  { %v80_v27 = vpop.f32.mrf.mxu1 }
 0x107   :  { %84 = vst.msk [vmem:[#allocation5] sm:$0xff] %vm83_vm1, %v80_v27 }
 0x10e   :  { %v176_v28 = vpop.f32.mrf.mxu1 }
 0x10f   :  { %180 = vst.msk [vmem:[#allocation5 + $0x10] sm:$0xff] %vm83_vm1, %v176_v28 }
 0x111   :  { %v128_v29 = vpop.f32.mrf.mxu3 }
 0x112   :  { %132 = vst.msk [vmem:[#allocation5 + $0x8] sm:$0xff] %vm83_vm1, %v128_v29 }
 0x116   :  { %v272_v30 = vpop.f32.mrf.mxu1 }
 0x117   :  { %276 = vst.msk [vmem:[#allocation5 + $0x20] sm:$0xff] %vm83_vm1, %v272_v30 }
 0x119   :  { %v224_v31 = vpop.f32.mrf.mxu3 }
 0x11a   :  { %228 = vst.msk [vmem:[#allocation5 + $0x18] sm:$0xff] %vm83_vm1, %v224_v31 }
 0x11e   :  { %v368_v32 = vpop.f32.mrf.mxu1 }
 0x11f   :  { %372 = vst.msk [vmem:[#allocation5 + $0x30] sm:$0xff] %vm83_vm1, %v368_v32 }
 0x121   :  { %v320_v33 = vpop.f32.mrf.mxu3 }
 0x122   :  { %324 = vst.msk [vmem:[#allocation5 + $0x28] sm:$0xff] %vm83_vm1, %v320_v33 }
 0x129   :  { %v416_v34 = vpop.f32.mrf.mxu3 }
 0x12a   :  { %420 = vst.msk [vmem:[#allocation5 + $0x38] sm:$0xff] %vm83_vm1, %v416_v34 }
 0x12b   :  { %433 = dma.vmem_to_hbm [thread:$0]  %s426_s23, 1024, %s428_s26, [#allocation4], %s513_s17, %s513_s17, %s514_s18  }
 0x12c   :  { %510 = dma.done.wait [#allocation4], 1024  }
 0x12d   :  { %511 = vsyncadd [#allocation4], 4294966272 }
 0x12e   :  { %438 = vsyncpa [#allocation3], 1 }
 0x12f   :  { %439 = vsyncpa [#allocation4], 1 }

</bundles_post_ra>
